<compile_context>
chip_gen: v7x
topology: tpu7x:2x2x1
jax: 0.10.0
libtpu: 0.0.40
codegen_flags: <defaults>
</compile_context>

<pallas_src>
import functools

import jax
import jax.numpy as jnp
from jax.experimental import pallas as pl
from jax.experimental.pallas import tpu as pltpu

LANES = 128
MAX_ROW_TILE = 2048  # 2048 x 128 f32 = 1 MiB per input block


def _bce_partial_kernel(out_ref, tgt_ref, psum_ref, *, rows, row_tile):
    """One grid step: per-block (8, 128) partial sum of BCE terms."""
    o = out_ref[...].astype(jnp.float32)
    t = tgt_ref[...].astype(jnp.float32)

    # PyTorch BCELoss clamps each log term at -100.
    log_o = jnp.maximum(jnp.log(o), jnp.float32(-100.0))
    log_1mo = jnp.maximum(jnp.log(1.0 - o), jnp.float32(-100.0))
    # -(t*log(o) + (1-t)*log(1-o)) rewritten to save a mul + sub on the VPU.
    loss = -(t * (log_o - log_1mo) + log_1mo)

    if rows % row_tile != 0:
        # Last block extends past the array; zero out the out-of-bounds rows.
        i = pl.program_id(0)
        local_row = jax.lax.broadcasted_iota(jnp.int32, (row_tile, LANES), 0)
        mask = (i * row_tile + local_row) < rows
        loss = jnp.where(mask, loss, jnp.float32(0.0))

    # Sublane-aligned vreg adds only (VALU); cross-lane reduce stays in JAX.
    psum_ref[...] = loss.reshape(row_tile // 8, 8, LANES).sum(axis=0)


def negetive_inference_gain(output, target, beta=0.1):
    """beta * BCELoss(output, target) with mean reduction."""
    assert output.shape == target.shape
    n_elems = output.size

    o_flat = output.reshape(-1)
    t_flat = target.reshape(-1)

    # Only needed if n_elems is not a multiple of 128 (rare); padding with
    # output=1 / target=1 contributes exactly 0 to the loss sum.
    lane_pad = (-n_elems) % LANES
    if lane_pad:
        o_flat = jnp.pad(o_flat, (0, lane_pad), constant_values=1)
        t_flat = jnp.pad(t_flat, (0, lane_pad), constant_values=1)

    rows = (n_elems + lane_pad) // LANES
    o2d = o_flat.reshape(rows, LANES)
    t2d = t_flat.reshape(rows, LANES)

    row_tile = min(MAX_ROW_TILE, ((rows + 7) // 8) * 8)
    n_blocks = pl.cdiv(rows, row_tile)

    kernel = functools.partial(
        _bce_partial_kernel, rows=rows, row_tile=row_tile
    )

    partial_sums = pl.pallas_call(
        kernel,
        out_shape=jax.ShapeDtypeStruct((n_blocks * 8, LANES), jnp.float32),
        grid_spec=pl.GridSpec(
            grid=(n_blocks,),
            in_specs=[
                pl.BlockSpec((row_tile, LANES), lambda i: (i, 0)),
                pl.BlockSpec((row_tile, LANES), lambda i: (i, 0)),
            ],
            out_specs=pl.BlockSpec((8, LANES), lambda i: (i, 0)),
        ),
        compiler_params=pltpu.CompilerParams(
            dimension_semantics=("parallel",)
        ),
    )(o2d, t2d)

    # Tiny final reduction + mean in JAX (n_blocks * 8 * 128 floats).
    mean_loss = jnp.sum(partial_sums) / jnp.float32(n_elems)
    return jnp.float32(beta) * mean_loss


if __name__ == "__main__":
    key = jax.random.PRNGKey(0)
    k1, k2 = jax.random.split(key)

    # Small NCHW-like shapes; BCELoss expects probabilities in [0, 1].
    shape = (2, 4, 16, 16)
    output = jax.nn.sigmoid(jax.random.normal(k1, shape, jnp.float32))
    target = (jax.random.uniform(k2, shape) > 0.5).astype(jnp.float32)

    result = negetive_inference_gain(output, target, beta=0.1)
    result = jax.block_until_ready(result)

    # Reference check in plain JAX (same clamping as PyTorch BCELoss).
    log_o = jnp.maximum(jnp.log(output), -100.0)
    log_1mo = jnp.maximum(jnp.log(1.0 - output), -100.0)
    ref = 0.1 * jnp.mean(-(target * log_o + (1.0 - target) * log_1mo))
    assert jnp.allclose(result, ref, rtol=1e-5, atol=1e-6), (result, ref)

    print("KERNEL_OK")
</pallas_src>

<mosaic_0001>
module attributes {stable_mosaic.version = 11 : i64} {
  func.func @_bce_partial_kernel(%arg0: i32, %arg1: memref<16x128xf32, #tpu.memory_space<vmem>>, %arg2: memref<16x128xf32, #tpu.memory_space<vmem>>, %arg3: memref<8x128xf32, #tpu.memory_space<vmem>>) attributes {dimension_semantics = [#tpu.dimension_semantics<parallel>], iteration_bounds = array<i64: 1>, scalar_prefetch = 0 : i64, scratch_operands = 0 : i64, tpu.core_type = #tpu.core_type<tc>, window_params = [{transform_indices = @transform_0, window_bounds = array<i64: 16, 128>}, {transform_indices = @transform_1, window_bounds = array<i64: 16, 128>}, {transform_indices = @transform_2, window_bounds = array<i64: 8, 128>}]} {
    %c0 = arith.constant 0 : index
    %c0_0 = arith.constant 0 : index
    %0 = vector.load %arg1[%c0, %c0_0] : memref<16x128xf32, #tpu.memory_space<vmem>>, vector<16x128xf32>
    %c0_1 = arith.constant 0 : index
    %c0_2 = arith.constant 0 : index
    %1 = vector.load %arg2[%c0_1, %c0_2] : memref<16x128xf32, #tpu.memory_space<vmem>>, vector<16x128xf32>
    %2 = math.log %0 : vector<16x128xf32>
    %cst = arith.constant -1.000000e+02 : f32
    %3 = vector.broadcast %cst : f32 to vector<16x128xf32>
    %4 = arith.maximumf %2, %3 : vector<16x128xf32>
    %cst_3 = arith.constant 1.000000e+00 : f32
    %5 = vector.broadcast %cst_3 : f32 to vector<16x128xf32>
    %6 = arith.subf %5, %0 : vector<16x128xf32>
    %7 = math.log %6 : vector<16x128xf32>
    %cst_4 = arith.constant -1.000000e+02 : f32
    %8 = vector.broadcast %cst_4 : f32 to vector<16x128xf32>
    %9 = arith.maximumf %7, %8 : vector<16x128xf32>
    %10 = arith.subf %4, %9 : vector<16x128xf32>
    %11 = arith.mulf %1, %10 : vector<16x128xf32>
    %12 = arith.addf %11, %9 : vector<16x128xf32>
    %cst_5 = arith.constant 0.000000e+00 : f32
    %13 = vector.broadcast %cst_5 : f32 to vector<16x128xf32>
    %14 = arith.subf %13, %12 : vector<16x128xf32>
    %15 = vector.shape_cast %14 : vector<16x128xf32> to vector<2x8x128xf32>
    %cst_6 = arith.constant dense<0.000000e+00> : vector<8x128xf32>
    %16 = vector.multi_reduction <add>, %15, %cst_6 [0] : vector<2x8x128xf32> to vector<8x128xf32>
    %c0_7 = arith.constant 0 : index
    %c0_8 = arith.constant 0 : index
    %17 = vector.load %arg3[%c0_7, %c0_8] : memref<8x128xf32, #tpu.memory_space<vmem>>, vector<8x128xf32>
    tpu.vector_store %arg3[%c0_7, %c0_8], %16 {strides = array<i32>} : memref<8x128xf32, #tpu.memory_space<vmem>>, vector<8x128xf32>,
    return
  }
  func.func @transform_0(%arg0: i32) -> (i32, i32) {
    %c0_i32 = arith.constant 0 : i32
    %c0_i32_0 = arith.constant 0 : i32
    return %arg0, %c0_i32 : i32, i32
  }
  func.func @transform_1(%arg0: i32) -> (i32, i32) {
    %c0_i32 = arith.constant 0 : i32
    %c0_i32_0 = arith.constant 0 : i32
    return %arg0, %c0_i32 : i32, i32
  }
  func.func @transform_2(%arg0: i32) -> (i32, i32) {
    %c0_i32 = arith.constant 0 : i32
    %c0_i32_0 = arith.constant 0 : i32
    return %arg0, %c0_i32 : i32, i32
  }
}

</mosaic_0001>

<bundles_post_ra>
// kernel: tpu_custom_call.1
= control target key start
LH: loop header
LB: loop body
LE: loop exit
PB: predicated region body
PF: predicated region fallthrough
CT: control target
= control target key end

     0   :  { %7 = vsyncpa [#allocation3], 0  ;;  %s225_s0 = inlined_call_operand.hbm [shape: f32[16,128], index: 0, kind: input, shape index: {}]   ;;  %s226_s1 = inlined_call_operand.hbm [shape: f32[16,128], index: 1, kind: input, shape index: {}]   ;;  %s227_s2 = inlined_call_operand.hbm [shape: f32[8,128], index: 2, kind: output, shape index: {}]  }
   0x1   :  { %8 = vsyncpa [#allocation6], 0 }
   0x2   :  { %9 = vsyncpa [#allocation4], 0  ;;  %s169_s9 = smov [#allocation2]   ;;  %s97_s13 = scalar_lea.hbm %s225_s0, 256 }
   0x3   :  { %s15_s10 = sshll.u32 %s169_s9, 4  ;;  %p98_p0 = scmp.ne.s32.totalorder %s225_s0, %s97_s13  ;;  %s16_s10 = int_to_ptr.vmem [resolvable:$true] %s15_s10 }
   0x4   :  { %p101_p1 = scmp.lt.u32.totalorder %s97_s13, %s225_s0 }
   0x6   :  { %p103_p2 = pnand %p101_p1, %p98_p0 }
   0x8   :  { %106 = shalt.err (!%p103_p2)
}
   0x9   :  { %s107_s18 = scalar_lea.vmem %s16_s10, 256  ;;  %p112_p4 = scmp.lt.s32.totalorder %s16_s10, %s16_s10 }
   0xa   :  { %p108_p3 = scmp.ne.s32.totalorder %s16_s10, %s107_s18  ;;  %p113_p5 = scmp.lt.s32.totalorder %s107_s18, %s107_s18 }
   0xc   :  { %p114_p6 = por %p113_p5, %p112_p4 }
   0xe   :  { %p115_p7 = pnand %p114_p6, %p108_p3 }
  0x10   :  { %118 = shalt.err (!%p115_p7)
}
  0x11   :  { %s170_s19 = smov 128   ;;  %s171_s20 = smov 8  }
  0x12   :  { %21 = dma.hbm_to_vmem [thread:$0]  %s225_s0, 256, %s16_s10, [#allocation3], %s170_s19, %s170_s19, %s171_s20  }
  0x13   :  { %s172_s23 = smov [#allocation5]   ;;  %s119_s27 = scalar_lea.hbm %s226_s1, 256 }
  0x14   :  { %s27_s24 = sshll.u32 %s172_s23, 4  ;;  %p120_p8 = scmp.ne.s32.totalorder %s226_s1, %s119_s27  ;;  %s28_s24 = int_to_ptr.vmem [resolvable:$true] %s27_s24 }
  0x15   :  { %p123_p9 = scmp.lt.u32.totalorder %s119_s27, %s226_s1 }
  0x17   :  { %p125_p10 = pnand %p123_p9, %p120_p8 }
  0x19   :  { %128 = shalt.err (!%p125_p10)
}
  0x1a   :  { %s129_s4 = scalar_lea.vmem %s28_s24, 256  ;;  %p134_p12 = scmp.lt.s32.totalorder %s28_s24, %s28_s24 }
  0x1b   :  { %p130_p11 = scmp.ne.s32.totalorder %s28_s24, %s129_s4  ;;  %p135_p13 = scmp.lt.s32.totalorder %s129_s4, %s129_s4 }
  0x1d   :  { %p136_p0 = por %p135_p13, %p134_p12 }
  0x1f   :  { %p137_p1 = pnand %p136_p0, %p130_p11 }
  0x21   :  { %140 = shalt.err (!%p137_p1)
}
  0x22   :  { %33 = dma.hbm_to_vmem [thread:$0]  %s226_s1, 256, %s28_s24, [#allocation6], %s170_s19, %s170_s19, %s171_s20  }
  0x23   :  { %163 = dma.done.wait [#allocation3], 256  }
  0x24   :  { %164 = vsyncadd [#allocation3], 4294967040 }
  0x25   :  { %165 = dma.done.wait [#allocation6], 256  }
  0x26   :  { %166 = vsyncadd [#allocation6], 4294967040  ;;  %v40_v0 = vld [vmem:[#allocation2] sm:$0xff]  ;;  %v41_v1 = vld [vmem:[#allocation2 + $0x8] sm:$0xff]  ;;  %s173_s1 = smov [#allocation7]  }
  0x27   :  { %89 = vlog2.f32 %v40_v0  ;;  %v50_v2 = vsub.f32 1.0, %v40_v0  ;;  %v51_v3 = vsub.f32 1.0, %v41_v1  ;;  %v42_v15 = vld [vmem:[#allocation5] sm:$0xff]  ;;  %v43_v17 = vld [vmem:[#allocation5 + $0x8] sm:$0xff]  ;;  %s74_s6 = sshll.u32 %s173_s1, 4  ;;  %s75_s6 = int_to_ptr.vmem [resolvable:$true] %s74_s6 }
  0x28   :  { %91 = vlog2.f32 %v41_v1  ;;  %s141_s7 = scalar_lea.vmem %s75_s6, 128  ;;  %p146_p3 = scmp.lt.s32.totalorder %s75_s6, %s75_s6 }
  0x29   :  { %93 = vlog2.f32 %v50_v2  ;;  %p142_p2 = scmp.ne.s32.totalorder %s75_s6, %s141_s7  ;;  %p147_p4 = scmp.lt.s32.totalorder %s141_s7, %s141_s7 }
  0x2a   :  { %95 = vlog2.f32 %v51_v3 }
  0x2b   :  { %p148_p5 = por %p147_p4, %p146_p3 }
  0x2d   :  { %p149_p6 = pnand %p148_p5, %p142_p2 }
  0x31   :  { %v90_v4 = vpop.eup %89 }
  0x32   :  { %v92_v5 = vpop.eup %91  ;;  %v45_v6 = vmul.f32 0.6931472, %v90_v4 }
  0x33   :  { %v94_v7 = vpop.eup %93  ;;  %v47_v8 = vmul.f32 0.6931472, %v92_v5 }
  0x34   :  { %v96_v9 = vpop.eup %95  ;;  %v48_v10 = vmax.f32 %v45_v6, -100.0  ;;  %v53_v11 = vmul.f32 0.6931472, %v94_v7 }
  0x35   :  { %v49_v12 = vmax.f32 %v47_v8, -100.0  ;;  %v55_v13 = vmul.f32 0.6931472, %v96_v9 }
  0x36   :  { %v56_v14 = vmax.f32 %v53_v11, -100.0 }
  0x37   :  { %v57_v16 = vmax.f32 %v55_v13, -100.0 }
  0x38   :  { %v58_v18 = vsub.f32 %v48_v10, %v56_v14 }
  0x39   :  { %v59_v19 = vsub.f32 %v49_v12, %v57_v16 }
  0x3a   :  { %v60_v20 = vmul.f32 %v58_v18, %v42_v15 }
  0x3b   :  { %v61_v21 = vmul.f32 %v59_v19, %v43_v17 }
  0x3c   :  { %v62_v22 = vadd.f32 %v60_v20, %v56_v14 }
  0x3d   :  { %v63_v23 = vadd.f32 %v61_v21, %v57_v16 }
  0x3e   :  { %v64_v24 = vsub.f32 0.0, %v62_v22 }
  0x3f   :  { %v65_v25 = vsub.f32 0.0, %v63_v23 }
  0x41   :  { %v66_v26 = vadd.f32 %v65_v25, %v64_v24 }
  0x43   :  { %67 = vst [vmem:[#allocation7] sm:$0xff] %v66_v26 }
  0x44   :  { %152 = shalt.err (!%p149_p6)
}
  0x45   :  { %s153_s10 = scalar_lea.hbm %s227_s2, 128 }
  0x46   :  { %p154_p7 = scmp.ne.s32.totalorder %s227_s2, %s153_s10  ;;  %p157_p8 = scmp.lt.u32.totalorder %s153_s10, %s227_s2 }
  0x48   :  { %p159_p9 = pnand %p157_p8, %p154_p7 }
  0x4a   :  { %162 = shalt.err (!%p159_p9)
}
  0x4b   :  { %77 = dma.vmem_to_hbm [thread:$0]  %s75_s6, 128, %s227_s2, [#allocation4]  }
  0x4c   :  { %167 = dma.done.wait [#allocation4], 128  }
  0x4d   :  { %168 = vsyncadd [#allocation4], 4294967168 }
  0x4e   :  { %81 = vsyncpa [#allocation3], 1 }
  0x4f   :  { %82 = vsyncpa [#allocation6], 1 }
  0x50   :  { %83 = vsyncpa [#allocation4], 1 }

</bundles_post_ra>
